<compile_context>
chip_gen: v7x
topology: tpu7x:2x2x1
jax: 0.10.0
libtpu: 0.0.40
codegen_flags: <defaults>
</compile_context>

<pallas_src>
import jax
import jax.numpy as jnp
from jax.experimental import pallas as pl
from jax.experimental.pallas import tpu as pltpu


def _dice_counts_kernel(logits_ref, labels_ref, tp_ref, pc_ref, tc_ref,
                        tp_acc, pc_acc, tc_acc):
    t = pl.program_id(1)

    @pl.when(t == 0)
    def _():
        tp_acc[...] = jnp.zeros_like(tp_acc)
        pc_acc[...] = jnp.zeros_like(pc_acc)
        tc_acc[...] = jnp.zeros_like(tc_acc)

    logits = logits_ref[0]            # (C, T) float32, classes on sublanes
    labels = labels_ref[0]            # (1, T) int32 (-1 marks padded pixels)
    C, T = logits.shape

    # Per-pixel argmax over classes via a small unrolled elementwise running
    # max (C is small and static).  Strict '>' keeps first-max tie-breaking,
    # matching torch.max / jnp.argmax semantics.
    best_val = logits[0:1, :]
    best_idx = jnp.zeros((1, T), dtype=jnp.int32)
    for c in range(1, C):
        v = logits[c:c + 1, :]
        better = v > best_val
        best_val = jnp.where(better, v, best_val)
        best_idx = jnp.where(better, c, best_idx)

    valid = labels >= 0                                        # (1, T)
    class_ids = jax.lax.broadcasted_iota(jnp.int32, (C, T), 0)  # (C, T)
    pred_eq = (best_idx == class_ids) & valid                  # (C, T)
    true_eq = labels == class_ids                              # (C, T)

    # Pure elementwise int32 accumulation; no cross-lane work per tile.
    tp_acc[...] += (pred_eq & true_eq).astype(jnp.int32)
    pc_acc[...] += pred_eq.astype(jnp.int32)
    tc_acc[...] += true_eq.astype(jnp.int32)

    # Cross-lane reduce only once per batch element, on the last pixel tile.
    @pl.when(t == pl.num_programs(1) - 1)
    def _():
        tp_ref[0] = jnp.sum(tp_acc[...], axis=1, keepdims=True)   # (C, 1)
        pc_ref[0] = jnp.sum(pc_acc[...], axis=1, keepdims=True)
        tc_ref[0] = jnp.sum(tc_acc[...], axis=1, keepdims=True)


def _choose_pixel_tile(n_pix, n_classes, target_block_bytes=512 * 1024):
    # ~0.5 MB logits block per grid step; pixel tile is a multiple of 128 and
    # never exceeds the (128-padded) pixel count of one image.
    t = max(128, (target_block_bytes // (4 * n_classes)) // 128 * 128)
    n_pad = (n_pix + 127) // 128 * 128
    return min(t, n_pad)


def _dice_counts(logits, labels, tile):
    """logits: [B2, C, Np] f32; labels: [B2, 1, Np] i32, with Np % tile == 0."""
    B2, C, Np = logits.shape
    n_tiles = Np // tile

    out_shape = tuple(
        jax.ShapeDtypeStruct((B2, C, 1), jnp.int32) for _ in range(3))
    tp, pc, tc = pl.pallas_call(
        _dice_counts_kernel,
        out_shape=out_shape,
        grid_spec=pltpu.PrefetchScalarGridSpec(
            num_scalar_prefetch=0,
            grid=(B2, n_tiles),
            in_specs=[
                pl.BlockSpec((1, C, tile), lambda b, t: (b, 0, t)),
                pl.BlockSpec((1, 1, tile), lambda b, t: (b, 0, t)),
            ],
            out_specs=[
                pl.BlockSpec((1, C, 1), lambda b, t: (b, 0, 0)),
                pl.BlockSpec((1, C, 1), lambda b, t: (b, 0, 0)),
                pl.BlockSpec((1, C, 1), lambda b, t: (b, 0, 0)),
            ],
            scratch_shapes=[pltpu.VMEM((C, tile), jnp.int32)] * 3,
        ),
        compiler_params=pltpu.CompilerParams(
            dimension_semantics=("parallel", "arbitrary")),
    )(logits, labels)
    # Sum over the batch axis in int32 (exact up to ~2.1e9 pixels per class).
    return tp.sum(axis=0)[:, 0], pc.sum(axis=0)[:, 0], tc.sum(axis=0)[:, 0]


def segmentation_dice_coefficient_dual(true_masks, out):
    """true_masks: [B, 2, H, W] int; out: [B, 2, C, H, W] float.

    Returns per-class dice, shape [C], float32 (PyTorch returns a float64
    numpy array; values match in float32 precision).
    """
    B, two, C, H, W = out.shape
    assert two == 2 and true_masks.shape == (B, 2, H, W)

    N = H * W
    # Contiguous reshapes only: no NCHW->NHWC transpose, no concat copy.  The
    # dual concatenation only reorders pixels, which the counts are invariant to.
    logits = out.reshape(B * 2, C, N).astype(jnp.float32)
    labels = true_masks.reshape(B * 2, 1, N).astype(jnp.int32)

    tile = _choose_pixel_tile(N, C)
    Np = (N + tile - 1) // tile * tile
    if Np != N:
        logits = jnp.pad(logits, ((0, 0), (0, 0), (0, Np - N)))
        labels = jnp.pad(labels, ((0, 0), (0, 0), (0, Np - N)),
                         constant_values=-1)

    tp, pc, tc = _dice_counts(logits, labels, tile)
    return 2.0 * tp.astype(jnp.float32) / (pc + tc).astype(jnp.float32)


def _reference(true_masks, out):
    B, two, C, H, W = out.shape
    tm = jnp.concatenate([true_masks[:, 0], true_masks[:, 1]], axis=0).reshape(-1)
    o = jnp.concatenate([out[:, 0], out[:, 1]], axis=0)
    probs = jnp.transpose(o, (0, 2, 3, 1)).reshape(-1, C)
    pred = jnp.argmax(probs, axis=1)
    dice = []
    for c in range(C):
        tp = jnp.sum((pred == c) & (tm == c)).astype(jnp.float32)
        div = (jnp.sum(pred == c) + jnp.sum(tm == c)).astype(jnp.float32)
        dice.append(2.0 * tp / div)
    return jnp.stack(dice)


if __name__ == "__main__":
    B, C, H, W = 2, 4, 16, 16
    key = jax.random.PRNGKey(0)
    k1, k2 = jax.random.split(key)
    true_masks = jax.random.randint(k1, (B, 2, H, W), 0, C, dtype=jnp.int32)
    out = jax.random.normal(k2, (B, 2, C, H, W), dtype=jnp.float32)

    dice = segmentation_dice_coefficient_dual(true_masks, out)
    dice = jax.block_until_ready(dice)

    ref = _reference(true_masks, out)
    assert jnp.allclose(dice, ref, atol=1e-6), (dice, ref)

    print("KERNEL_OK")
</pallas_src>

<mosaic_0001>
module attributes {stable_mosaic.version = 11 : i64} {
  func.func @_dice_counts_kernel(%arg0: i32, %arg1: i32, %arg2: memref<1x4x256xf32, #tpu.memory_space<vmem>>, %arg3: memref<1x1x256xi32, #tpu.memory_space<vmem>>, %arg4: memref<1x4x1xi32, #tpu.memory_space<vmem>>, %arg5: memref<1x4x1xi32, #tpu.memory_space<vmem>>, %arg6: memref<1x4x1xi32, #tpu.memory_space<vmem>>, %arg7: memref<4x256xi32, #tpu.memory_space<vmem>>, %arg8: memref<4x256xi32, #tpu.memory_space<vmem>>, %arg9: memref<4x256xi32, #tpu.memory_space<vmem>>) attributes {dimension_semantics = [#tpu.dimension_semantics<parallel>, #tpu.dimension_semantics<arbitrary>], iteration_bounds = array<i64: 4, 1>, scalar_prefetch = 0 : i64, scratch_operands = 3 : i64, tpu.core_type = #tpu.core_type<tc>, window_params = [{transform_indices = @transform_0, window_bounds = array<i64: 1, 4, 256>}, {transform_indices = @transform_1, window_bounds = array<i64: 1, 1, 256>}, {transform_indices = @transform_2, window_bounds = array<i64: 1, 4, 1>}, {transform_indices = @transform_3, window_bounds = array<i64: 1, 4, 1>}, {transform_indices = @transform_4, window_bounds = array<i64: 1, 4, 1>}]} {
    %c0_i32 = arith.constant 0 : i32
    %0 = arith.cmpi eq, %arg1, %c0_i32 : i32
    %1 = arith.extui %0 : i1 to i32
    %c0_i32_0 = arith.constant 0 : i32
    %2 = arith.cmpi ne, %1, %c0_i32_0 : i32
    scf.if %2 {
      %c0_i32_22 = arith.constant 0 : i32
      %48 = vector.broadcast %c0_i32_22 : i32 to vector<4x256xi32>
      %c0_23 = arith.constant 0 : index
      %c0_24 = arith.constant 0 : index
      %49 = vector.load %arg7[%c0_23, %c0_24] : memref<4x256xi32, #tpu.memory_space<vmem>>, vector<4x256xi32>
      tpu.vector_store %arg7[%c0_23, %c0_24], %48 {strides = array<i32>} : memref<4x256xi32, #tpu.memory_space<vmem>>, vector<4x256xi32>,
      %c0_i32_25 = arith.constant 0 : i32
      %50 = vector.broadcast %c0_i32_25 : i32 to vector<4x256xi32>
      %c0_26 = arith.constant 0 : index
      %c0_27 = arith.constant 0 : index
      %51 = vector.load %arg8[%c0_26, %c0_27] : memref<4x256xi32, #tpu.memory_space<vmem>>, vector<4x256xi32>
      tpu.vector_store %arg8[%c0_26, %c0_27], %50 {strides = array<i32>} : memref<4x256xi32, #tpu.memory_space<vmem>>, vector<4x256xi32>,
      %c0_i32_28 = arith.constant 0 : i32
      %52 = vector.broadcast %c0_i32_28 : i32 to vector<4x256xi32>
      %c0_29 = arith.constant 0 : index
      %c0_30 = arith.constant 0 : index
      %53 = vector.load %arg9[%c0_29, %c0_30] : memref<4x256xi32, #tpu.memory_space<vmem>>, vector<4x256xi32>
      tpu.vector_store %arg9[%c0_29, %c0_30], %52 {strides = array<i32>} : memref<4x256xi32, #tpu.memory_space<vmem>>, vector<4x256xi32>,
    } else {
    }
    %c0 = arith.constant 0 : index
    %c0_1 = arith.constant 0 : index
    %c0_2 = arith.constant 0 : index
    %3 = vector.load %arg2[%c0, %c0_1, %c0_2] : memref<1x4x256xf32, #tpu.memory_space<vmem>>, vector<1x4x256xf32>
    %4 = vector.shape_cast %3 : vector<1x4x256xf32> to vector<4x256xf32>
    %c0_3 = arith.constant 0 : index
    %c0_4 = arith.constant 0 : index
    %c0_5 = arith.constant 0 : index
    %5 = vector.load %arg3[%c0_3, %c0_4, %c0_5] : memref<1x1x256xi32, #tpu.memory_space<vmem>>, vector<1x1x256xi32>
    %6 = vector.shape_cast %5 : vector<1x1x256xi32> to vector<1x256xi32>
    %7 = vector.extract_strided_slice %4 {offsets = [0, 0], sizes = [1, 256], strides = [1, 1]} : vector<4x256xf32> to vector<1x256xf32>
    %c0_i32_6 = arith.constant 0 : i32
    %8 = vector.broadcast %c0_i32_6 : i32 to vector<1x256xi32>
    %9 = vector.extract_strided_slice %4 {offsets = [1, 0], sizes = [1, 256], strides = [1, 1]} : vector<4x256xf32> to vector<1x256xf32>
    %10 = arith.cmpf ogt, %9, %7 : vector<1x256xf32>
    %11 = arith.select %10, %9, %7 : vector<1x256xi1>, vector<1x256xf32>
    %c1_i32 = arith.constant 1 : i32
    %12 = vector.broadcast %c1_i32 : i32 to vector<1x256xi32>
    %13 = arith.select %10, %12, %8 : vector<1x256xi1>, vector<1x256xi32>
    %14 = vector.extract_strided_slice %4 {offsets = [2, 0], sizes = [1, 256], strides = [1, 1]} : vector<4x256xf32> to vector<1x256xf32>
    %15 = arith.cmpf ogt, %14, %11 : vector<1x256xf32>
    %16 = arith.select %15, %14, %11 : vector<1x256xi1>, vector<1x256xf32>
    %c2_i32 = arith.constant 2 : i32
    %17 = vector.broadcast %c2_i32 : i32 to vector<1x256xi32>
    %18 = arith.select %15, %17, %13 : vector<1x256xi1>, vector<1x256xi32>
    %19 = vector.extract_strided_slice %4 {offsets = [3, 0], sizes = [1, 256], strides = [1, 1]} : vector<4x256xf32> to vector<1x256xf32>
    %20 = arith.cmpf ogt, %19, %16 : vector<1x256xf32>
    %c3_i32 = arith.constant 3 : i32
    %21 = vector.broadcast %c3_i32 : i32 to vector<1x256xi32>
    %22 = arith.select %20, %21, %18 : vector<1x256xi1>, vector<1x256xi32>
    %c0_i32_7 = arith.constant 0 : i32
    %23 = vector.broadcast %c0_i32_7 : i32 to vector<1x256xi32>
    %24 = arith.cmpi sge, %6, %23 : vector<1x256xi32>
    %25 = tpu.iota {dimensions = array<i32: 0>} : vector<4x256xi32>
    %26 = vector.broadcast %22 : vector<1x256xi32> to vector<4x256xi32>
    %27 = arith.cmpi eq, %26, %25 : vector<4x256xi32>
    %28 = vector.broadcast %24 : vector<1x256xi1> to vector<4x256xi1>
    %29 = arith.andi %27, %28 : vector<4x256xi1>
    %30 = vector.broadcast %6 : vector<1x256xi32> to vector<4x256xi32>
    %31 = arith.cmpi eq, %30, %25 : vector<4x256xi32>
    %c0_8 = arith.constant 0 : index
    %c0_9 = arith.constant 0 : index
    %32 = vector.load %arg7[%c0_8, %c0_9] : memref<4x256xi32, #tpu.memory_space<vmem>>, vector<4x256xi32>
    %33 = arith.andi %29, %31 : vector<4x256xi1>
    %34 = arith.extui %33 : vector<4x256xi1> to vector<4x256xi32>
    %35 = arith.addi %32, %34 : vector<4x256xi32>
    %c0_10 = arith.constant 0 : index
    %c0_11 = arith.constant 0 : index
    %36 = vector.load %arg7[%c0_10, %c0_11] : memref<4x256xi32, #tpu.memory_space<vmem>>, vector<4x256xi32>
    tpu.vector_store %arg7[%c0_10, %c0_11], %35 {strides = array<i32>} : memref<4x256xi32, #tpu.memory_space<vmem>>, vector<4x256xi32>,
    %c0_12 = arith.constant 0 : index
    %c0_13 = arith.constant 0 : index
    %37 = vector.load %arg8[%c0_12, %c0_13] : memref<4x256xi32, #tpu.memory_space<vmem>>, vector<4x256xi32>
    %38 = arith.extui %29 : vector<4x256xi1> to vector<4x256xi32>
    %39 = arith.addi %37, %38 : vector<4x256xi32>
    %c0_14 = arith.constant 0 : index
    %c0_15 = arith.constant 0 : index
    %40 = vector.load %arg8[%c0_14, %c0_15] : memref<4x256xi32, #tpu.memory_space<vmem>>, vector<4x256xi32>
    tpu.vector_store %arg8[%c0_14, %c0_15], %39 {strides = array<i32>} : memref<4x256xi32, #tpu.memory_space<vmem>>, vector<4x256xi32>,
    %c0_16 = arith.constant 0 : index
    %c0_17 = arith.constant 0 : index
    %41 = vector.load %arg9[%c0_16, %c0_17] : memref<4x256xi32, #tpu.memory_space<vmem>>, vector<4x256xi32>
    %42 = arith.extui %31 : vector<4x256xi1> to vector<4x256xi32>
    %43 = arith.addi %41, %42 : vector<4x256xi32>
    %c0_18 = arith.constant 0 : index
    %c0_19 = arith.constant 0 : index
    %44 = vector.load %arg9[%c0_18, %c0_19] : memref<4x256xi32, #tpu.memory_space<vmem>>, vector<4x256xi32>
    tpu.vector_store %arg9[%c0_18, %c0_19], %43 {strides = array<i32>} : memref<4x256xi32, #tpu.memory_space<vmem>>, vector<4x256xi32>,
    %c0_i32_20 = arith.constant 0 : i32
    %45 = arith.cmpi eq, %arg1, %c0_i32_20 : i32
    %46 = arith.extui %45 : i1 to i32
    %c0_i32_21 = arith.constant 0 : i32
    %47 = arith.cmpi ne, %46, %c0_i32_21 : i32
    scf.if %47 {
      %c0_22 = arith.constant 0 : index
      %c0_23 = arith.constant 0 : index
      %48 = vector.load %arg7[%c0_22, %c0_23] : memref<4x256xi32, #tpu.memory_space<vmem>>, vector<4x256xi32>
      %cst = arith.constant dense<0> : vector<4xi32>
      %49 = vector.multi_reduction <add>, %48, %cst [1] : vector<4x256xi32> to vector<4xi32>
      %50 = vector.shape_cast %49 : vector<4xi32> to vector<4x1xi32>
      %c0_24 = arith.constant 0 : index
      %c0_25 = arith.constant 0 : index
      %c0_26 = arith.constant 0 : index
      %51 = vector.load %arg4[%c0_24, %c0_25, %c0_26] : memref<1x4x1xi32, #tpu.memory_space<vmem>>, vector<1x4x1xi32>
      %52 = vector.shape_cast %51 : vector<1x4x1xi32> to vector<4x1xi32>
      %53 = vector.shape_cast %50 : vector<4x1xi32> to vector<1x4x1xi32>
      tpu.vector_store %arg4[%c0_24, %c0_25, %c0_26], %53 {strides = array<i32>} : memref<1x4x1xi32, #tpu.memory_space<vmem>>, vector<1x4x1xi32>,
      %c0_27 = arith.constant 0 : index
      %c0_28 = arith.constant 0 : index
      %54 = vector.load %arg8[%c0_27, %c0_28] : memref<4x256xi32, #tpu.memory_space<vmem>>, vector<4x256xi32>
      %cst_29 = arith.constant dense<0> : vector<4xi32>
      %55 = vector.multi_reduction <add>, %54, %cst_29 [1] : vector<4x256xi32> to vector<4xi32>
      %56 = vector.shape_cast %55 : vector<4xi32> to vector<4x1xi32>
      %c0_30 = arith.constant 0 : index
      %c0_31 = arith.constant 0 : index
      %c0_32 = arith.constant 0 : index
      %57 = vector.load %arg5[%c0_30, %c0_31, %c0_32] : memref<1x4x1xi32, #tpu.memory_space<vmem>>, vector<1x4x1xi32>
      %58 = vector.shape_cast %57 : vector<1x4x1xi32> to vector<4x1xi32>
      %59 = vector.shape_cast %56 : vector<4x1xi32> to vector<1x4x1xi32>
      tpu.vector_store %arg5[%c0_30, %c0_31, %c0_32], %59 {strides = array<i32>} : memref<1x4x1xi32, #tpu.memory_space<vmem>>, vector<1x4x1xi32>,
      %c0_33 = arith.constant 0 : index
      %c0_34 = arith.constant 0 : index
      %60 = vector.load %arg9[%c0_33, %c0_34] : memref<4x256xi32, #tpu.memory_space<vmem>>, vector<4x256xi32>
      %cst_35 = arith.constant dense<0> : vector<4xi32>
      %61 = vector.multi_reduction <add>, %60, %cst_35 [1] : vector<4x256xi32> to vector<4xi32>
      %62 = vector.shape_cast %61 : vector<4xi32> to vector<4x1xi32>
      %c0_36 = arith.constant 0 : index
      %c0_37 = arith.constant 0 : index
      %c0_38 = arith.constant 0 : index
      %63 = vector.load %arg6[%c0_36, %c0_37, %c0_38] : memref<1x4x1xi32, #tpu.memory_space<vmem>>, vector<1x4x1xi32>
      %64 = vector.shape_cast %63 : vector<1x4x1xi32> to vector<4x1xi32>
      %65 = vector.shape_cast %62 : vector<4x1xi32> to vector<1x4x1xi32>
      tpu.vector_store %arg6[%c0_36, %c0_37, %c0_38], %65 {strides = array<i32>} : memref<1x4x1xi32, #tpu.memory_space<vmem>>, vector<1x4x1xi32>,
    } else {
    }
    return
  }
  func.func @transform_0(%arg0: i32, %arg1: i32) -> (i32, i32, i32) {
    %c0_i32 = arith.constant 0 : i32
    %c0_i32_0 = arith.constant 0 : i32
    return %arg0, %c0_i32, %arg1 : i32, i32, i32
  }
  func.func @transform_1(%arg0: i32, %arg1: i32) -> (i32, i32, i32) {
    %c0_i32 = arith.constant 0 : i32
    %c0_i32_0 = arith.constant 0 : i32
    return %arg0, %c0_i32, %arg1 : i32, i32, i32
  }
  func.func @transform_2(%arg0: i32, %arg1: i32) -> (i32, i32, i32) {
    %c0_i32 = arith.constant 0 : i32
    %c0_i32_0 = arith.constant 0 : i32
    %c0_i32_1 = arith.constant 0 : i32
    return %arg0, %c0_i32, %c0_i32_0 : i32, i32, i32
  }
  func.func @transform_3(%arg0: i32, %arg1: i32) -> (i32, i32, i32) {
    %c0_i32 = arith.constant 0 : i32
    %c0_i32_0 = arith.constant 0 : i32
    %c0_i32_1 = arith.constant 0 : i32
    return %arg0, %c0_i32, %c0_i32_0 : i32, i32, i32
  }
  func.func @transform_4(%arg0: i32, %arg1: i32) -> (i32, i32, i32) {
    %c0_i32 = arith.constant 0 : i32
    %c0_i32_0 = arith.constant 0 : i32
    %c0_i32_1 = arith.constant 0 : i32
    return %arg0, %c0_i32, %c0_i32_0 : i32, i32, i32
  }
}

</mosaic_0001>

<bundles_post_ra>
// kernel: tpu_custom_call.1
= control target key start
LH: loop header
LB: loop body
LE: loop exit
PB: predicated region body
PF: predicated region fallthrough
CT: control target
= control target key end

     0   :  { %10 = vsyncpa [#allocation6], 0  ;;  %s1021_s0 = inlined_call_operand.hbm [shape: f32[4,4,256], index: 0, kind: input, shape index: {}]   ;;  %s1022_s1 = inlined_call_operand.hbm [shape: s32[4,1,256], index: 1, kind: input, shape index: {}]   ;;  %s1023_s2 = inlined_call_operand.vmem [shape: s32[4,4,1], index: 2, kind: output, shape index: {0}]   ;;  %s1024_s3 = inlined_call_operand.vmem [shape: s32[4,4,1], index: 3, kind: output, shape index: {1}]   ;;  %s1025_s4 = inlined_call_operand.vmem [shape: s32[4,4,1], index: 4, kind: output, shape index: {2}]  }
   0x1   :  { %12 = vsyncpa [#allocation6 + $0x1], 0 }
   0x2   :  { %13 = vsyncpa [#allocation8], 0 }
   0x3   :  { %15 = vsyncpa [#allocation8 + $0x1], 0  ;;  %s838_s15 = smov 0   ;;  %s840_s16 = smov 0  }
   0x4   :  { %s842_s17 = smov 0   ;;  %s844_s18 = smov 0  }
   0x5   :  { %s846_s19 = smov 0   ;;  %s848_s20 = smov 0  }
   0x6 LB: > { %s610_s21 = sadd.s32 4294967295, %s808_s20   ;;  %s33_s22 = sadd.s32 1, %s804_s19  ;;  %s808_s20 = sphi %s848_s20, %s21_s20   ;;  %s804_s19 = sphi %s846_s19, %s1039_s19   ;;  %s800_s18 = sphi %s844_s18, %s1038_s18   ;;  %s796_s17 = sphi %s842_s17, %s1037_s17   ;;  %s792_s16 = sphi %s840_s16, %s1036_s16   ;;  %s788_s15 = sphi %s838_s15, %s1035_s15  }
   0x7   : > { %p35_p0 = scmp.ge.s32.totalorder %s33_s22, 4  ;;  %s42_s23 = sadd.s32 1, %s796_s17 }
   0x8   : > { %p49_p1 = scmp.ne.s32.totalorder %s796_s17, %s792_s16  ;;  %p50_p2 = scmp.eq.s32.totalorder %s808_s20, 0 }
   0x9   : > { %s1041_s22 = smov (%p35_p0, %s33_s22), 0  ;;  %p55_p4 = scmp.ne.s32.totalorder %s792_s16, %s788_s15 }
   0xa   : > { %p874_p3 = por %p50_p2, %p49_p1  ;;  %s37_s25 = ssub.s32 %s804_s19, %s1041_s22 }
   0xb   : > { %p56_p5 = scmp.eq.s32.totalorder %s610_s21, 0  ;;  %p40_p6 = scmp.eq.s32.totalorder %s37_s25, 0 }
   0xc   : > { %p644_p8 = scmp.lt.s32.totalorder %s808_s20, 4  ;;  %s890_s28 = sand.u32 1, %s796_s17  }
   0xd   : > { %p881_p7 = por %p56_p5, %p55_p4  ;;  %s628_s29 = sshll.u32 %s804_s19, 7 }
   0xe   : > { %s887_s27 = scalar_select %p40_p6, %s796_s17, %s42_s23  }
   0xf   : > { %s1028_s26 = scalar_select %p881_p7, 1, 0 }
  0x10   : > { %s614_s30 = sshll.u32 %s890_s28, 3  ;;  %s897_s7 = scalar_lea.hbm %s1021_s0, %s628_s29 }
  0x11   : > { %s189_s8 = scalar_lea.vmem [#allocation5], %s614_s30  ;;  %p901_p9 = pnand %p644_p8, %p874_p3 }
  0x12   : > { %s199_s9 = sshll.u32 %s189_s8, 4  ;;  %s186_s11 = scalar_lea.sflag [#allocation6], %s890_s28  ;;  %s905_s9 = int_to_ptr.vmem [resolvable:$true] %s199_s9 }
  0x13   : > { %s694_s12 = scalar_lea.hbm %s897_s7, 128  ;;  %p696_p13 = pneg %p901_p9 }
  0x14   : > { %p695_p12 = scmp.ne.s32.totalorder %s897_s7, %s694_s12  ;;  %s699_s15 = scalar_lea.hbm %s1021_s0, 512 }
  0x15   : > { %p700_p2 = scmp.lt.u32.totalorder %s897_s7, %s1021_s0  ;;  %p701_p3 = scmp.lt.u32.totalorder %s699_s15, %s694_s12 }
  0x16   : > { %p697_p0 = pnand %p696_p13, %p695_p12  ;;  %p703_p5 = scmp.lt.u32.totalorder %s694_s12, %s897_s7 }
  0x17   : > { %p702_p4 = por %p701_p3, %p700_p2 }
  0x18   : > { %p698_p1 = pneg %p697_p0 }
  0x19   : > { %p704_p6 = por %p703_p5, %p702_p4 }
  0x1b   : > { %p705_p8 = pnand %p704_p6, %p698_p1 }
  0x1d   : > { %708 = shalt.err (!%p705_p8)
}
  0x1e   : > { %s709_s24 = scalar_lea.vmem %s905_s9, 128  ;;  %s810_s25 = smov [#allocation5]  }
  0x1f   : > { %p710_p12 = scmp.ne.s32.totalorder %s905_s9, %s709_s24  ;;  %s714_s29 = sshll.u32 %s810_s25, 4  ;;  %s715_s29 = int_to_ptr.vmem [resolvable:$false] %s714_s29 }
  0x20   : > { %s716_s30 = scalar_lea.vmem %s715_s29, 256  ;;  %p717_p11 = scmp.lt.s32.totalorder %s905_s9, %s715_s29 }
  0x21   : > { %p712_p0 = pnand %p710_p12, %p696_p13  ;;  %p718_p2 = scmp.lt.s32.totalorder %s716_s30, %s709_s24 }
  0x23   : > { %p713_p10 = pneg %p712_p0  ;;  %p719_p3 = por %p718_p2, %p717_p11 }
  0x25   : > { %p720_p4 = pnand %p719_p3, %p713_p10 }
  0x27   : > { %723 = shalt.err (!%p720_p4)
}
  0x28   : > { %640 = dma.hbm_to_vmem [thread:$0]  (!%p901_p9), %s897_s7, 128, %s905_s9, %s186_s11  }
  0x29   : > { %p1030_p1 = scmp.lt.s32.totalorder %s808_s20, 5  ;;  %p1031_p5 = scmp.ge.s32.totalorder %s808_s20, 1 }
  0x2a   : > { %s617_s6 = sshll.u32 %s890_s28, 1  ;;  %s629_s8 = sshll.u32 %s804_s19, 5 }
  0x2b   : > { %p939_p6 = pnand %p1031_p5, %p1030_p1  ;;  %s948_s14 = scalar_lea.hbm %s1022_s1, %s629_s8 }
  0x2c   : > { %s210_s15 = scalar_lea.vmem [#allocation7], %s617_s6  ;;  %s207_s7 = scalar_lea.sflag [#allocation8], %s890_s28 }
  0x2d   : > { %s1032_s5 = scalar_select %p939_p6, 1, 0 }
  0x2e   : > { %s220_s21 = sshll.u32 %s210_s15, 4  ;;  %s724_s9 = scalar_lea.hbm %s948_s14, 32  ;;  %s221_s21 = int_to_ptr.vmem [resolvable:$true] %s220_s21 }
  0x2f   : > { %p725_p10 = scmp.ne.s32.totalorder %s948_s14, %s724_s9  ;;  %s729_s24 = scalar_lea.hbm %s1022_s1, 128 }
  0x30   : > { %p730_p12 = scmp.lt.u32.totalorder %s948_s14, %s1022_s1  ;;  %p731_p0 = scmp.lt.u32.totalorder %s729_s24, %s724_s9 }
  0x31   : > { %p727_p11 = pnand %p725_p10, %p696_p13  ;;  %p733_p3 = scmp.lt.u32.totalorder %s724_s9, %s948_s14 }
  0x32   : > { %p732_p2 = por %p731_p0, %p730_p12 }
  0x33   : > { %p728_p8 = pneg %p727_p11 }
  0x34   : > { %p734_p4 = por %p733_p3, %p732_p2 }
  0x36   : > { %p735_p1 = pnand %p734_p4, %p728_p8 }
  0x38   : > { %738 = shalt.err (!%p735_p1)
}
  0x39   : > { %s739_s28 = scalar_lea.vmem %s221_s21, 32  ;;  %s811_s30 = smov [#allocation7]  }
  0x3a   : > { %p740_p5 = scmp.ne.s32.totalorder %s221_s21, %s739_s28  ;;  %s744_s6 = sshll.u32 %s811_s30, 4  ;;  %s745_s6 = int_to_ptr.vmem [resolvable:$false] %s744_s6 }
  0x3b   : > { %s746_s8 = scalar_lea.vmem %s745_s6, 64  ;;  %p747_p7 = scmp.lt.s32.totalorder %s221_s21, %s745_s6 }
  0x3c   : > { %p742_p10 = pnand %p740_p5, %p696_p13  ;;  %p748_p6 = scmp.lt.s32.totalorder %s746_s8, %s739_s28 }
  0x3e   : > { %p743_p11 = pneg %p742_p10  ;;  %p749_p0 = por %p748_p6, %p747_p7 }
  0x40   : > { %p750_p12 = pnand %p749_p0, %p743_p11 }
  0x42   : > { %753 = shalt.err (!%p750_p12)
}
  0x43   : > { %643 = dma.hbm_to_vmem [thread:$0]  (!%p901_p9), %s948_s14, 32, %s221_s21, %s207_s7  }
  0x44   : > { %p1033_p8 = scmp.ne.s32.totalorder %s1032_s5, 0 }
  0x45   : > { %s231_s12 = sand.u32 (!%p1033_p8), 1, %s792_s16   ;;  %p1034_p13 = scmp.ne.s32.totalorder (!%p1033_p8), %s1028_s26, 0 }
  0x46   : > { %229 = sbr.rel (%p1033_p8) target bundleno = 266 (0x10a), region = 28  ;;  %s621_s13 = sshll.u32 (!%p1033_p8), %s231_s12, 3 }
  0x47   : > { %s232_s15 = scalar_lea.sflag (!%p1033_p8), [#allocation6], %s231_s12  ;;  %s235_s9 = scalar_lea.vmem (!%p1033_p8), [#allocation5], %s621_s13 }
  0x4d   : > { %779 = dma.done.wait (%p1034_p13), %s232_s15, 128  }
  0x4e   : > { %781 = vsyncadd (%p1034_p13), %s232_s15, 4294967168  ;;  %s622_s11 = sshll.u32 %s231_s12, 1  ;;  %s241_s23 = scalar_lea.sflag [#allocation8], %s231_s12 }
  0x4f   : > { %s244_s10 = scalar_lea.vmem [#allocation7], %s622_s11 }
  0x50   : > { %783 = dma.done.wait (%p1034_p13), %s241_s23, 32  }
  0x51   : > { %785 = vsyncadd (%p1034_p13), %s241_s23, 4294967264  ;;  %v324_v0 = vlaneseq  ;;  %v303_v4 = vld [vmem:[%s244_s10] sm:$0x3]  ;;  %v302_v5 = vld [vmem:[%s235_s9] sm:$0xff]  ;;  %vm392_vm0 = vcmask 1043456   ;;  %v812_v9 = vmov 0  }
  0x52   : > { %v305_v8 = vrot.slane %v302_v5, 7  ;;  %vm323_vm4 = vcmp.ge.s32.totalorder %v303_v4, 0  ;;  %p283_p7 = scmp.lt.s32.totalorder %s800_s18, 3  ;;  %vm408_vm15 = vcmask 3072  }
  0x53   : > { %v325_v1 = vshrl.u32 %v324_v0, 7  ;;  %v344_v23 = vsel %vm323_vm4, 1, %v812_v9 }
  0x54   : > { %vm307_vm3 = vcmp.gt.f32.partialorder %v302_v5, %v305_v8  ;;  %s1043_s18 = smov (!%p283_p7, %s800_s18), 3 }
  0x55   : > { %v347_v2 = vsub.s32 0, %v325_v1  ;;  %v351_v3 = vsub.s32 1, %v325_v1  ;;  %v308_v12 = vsel %vm307_vm3, %v302_v5, %v305_v8  ;;  %v309_v13 = vsel %vm307_vm3, 1, %v812_v9  ;;  %s623_s26 = sshll.u32 %s1043_s18, 2 }
  0x56   : > { %v311_v16 = vrot.slane %v308_v12, 7  ;;  %v315_v17 = vrot.slane %v309_v13, 7  ;;  %v328_v26 = vsub.s32 3, %v325_v1  ;;  %v332_v27 = vsub.s32 7, %v325_v1  ;;  %s286_s21 = scalar_lea.vmem %s1023_s2, %s623_s26  ;;  %s294_s25 = scalar_lea.vmem %s1025_s4, %s623_s26 }
  0x57   : > { %v360_v6 = vrot.slane %v303_v4, %v347_v2  ;;  %v364_v7 = vrot.slane %v303_v4, %v351_v3  ;;  %v348_v29 = vrot.slane %v344_v23, %v347_v2  ;;  %v352_v32 = vrot.slane %v344_v23, %v351_v3  ;;  %s290_s28 = scalar_lea.vmem %s1024_s3, %s623_s26 }
  0x58   : > { %vm313_vm5 = vcmp.gt.f32.partialorder %v302_v5, %v311_v16 }
  0x59   : > { %vm365_vm1 = vcmp.eq.s32.totalorder %v360_v6, %v325_v1  ;;  %vm366_vm2 = vcmp.eq.s32.totalorder %v364_v7, %v325_v1  ;;  %v314_v21 = vsel %vm313_vm5, %v302_v5, %v311_v16  ;;  %v316_v22 = vsel %vm313_vm5, 2, %v315_v17 }
  0x5a   : > { %v382_v10 = vsel %vm365_vm1, 1, %v812_v9  ;;  %v383_v11 = vsel %vm366_vm2, 1, %v812_v9  ;;  %v318_v24 = vrot.slane %v314_v21, 7  ;;  %v321_v25 = vrot.slane %v316_v22, 7 }
  0x5b   : > { %v384_v14 = vcombine.low %v382_v10, %v383_v11  ;;  %v632_v15 = vcombine.low %v383_v11, %v383_v11  ;;  %vm353_vm7 = vcmp.eq.s32.totalorder %v348_v29, 1  ;;  %vm354_vm8 = vcmp.eq.s32.totalorder %v352_v32, 1 }
  0x5c   : > { %vm320_vm6 = vcmp.gt.f32.partialorder %v302_v5, %v318_v24 }
  0x5d   : > { %v430_v18 = vsel %vm392_vm0, %v384_v14, 0  ;;  %v431_v19 = vsel %vm392_vm0, %v632_v15, 0  ;;  %v322_v31 = vsel %vm320_vm6, 3, %v321_v25 }
  0x5e   : > { %v432_v20 = vadd.s32 %v431_v19, %v430_v18  ;;  %v329_v33 = vrot.slane %v322_v31, %v328_v26  ;;  %v333_v34 = vrot.slane %v322_v31, %v332_v27 }
  0x60   : > { %v434_v28 = vshrl.u32 %v432_v20, 16  ;;  %v337_v35 = vrot.slane %v329_v33, %v328_v26  ;;  %v341_v36 = vrot.slane %v333_v34, %v328_v26  ;;  %v433_v55 = vand.u32 65535, %v432_v20 }
  0x62   : > { %v436_v30 = vcvt.s32.f32 %v434_v28  ;;  %vm342_vm9 = vcmp.eq.s32.totalorder %v337_v35, %v325_v1  ;;  %vm343_vm10 = vcmp.eq.s32.totalorder %v341_v36, %v325_v1  ;;  %v435_v59 = vcvt.s32.f32 %v433_v55 }
  0x63   : > { %vm355_vm11 = vmand %vm342_vm9, %vm353_vm7 }
  0x64   : > { %439 = vadd.xlane.f32.xlu1 %v436_v30  ;;  %vm356_vm12 = vmand %vm343_vm10, %vm354_vm8  ;;  %v376_v37 = vsel %vm355_vm11, 1, %v812_v9 }
  0x65   : > { %vm369_vm13 = vmand %vm356_vm12, %vm366_vm2  ;;  %v377_v38 = vsel %vm356_vm12, 1, %v812_v9 }
  0x66   : > { %v378_v39 = vcombine.low %v376_v37, %v377_v38  ;;  %v631_v40 = vcombine.low %v377_v38, %v377_v38  ;;  %vm368_vm14 = vmand %vm355_vm11, %vm365_vm1  ;;  %v371_v41 = vsel %vm369_vm13, 1, %v812_v9 }
  0x67   : > { %v370_v42 = vsel %vm368_vm14, 1, %v812_v9  ;;  %v630_v43 = vcombine.low %v371_v41, %v371_v41 }
  0x68   : > { %v412_v44 = vsel %vm392_vm0, %v378_v39, 0  ;;  %v413_v45 = vsel %vm392_vm0, %v631_v40, 0  ;;  %v372_v46 = vcombine.low %v370_v42, %v371_v41 }
  0x69   : > { %v414_v47 = vadd.s32 %v413_v45, %v412_v44  ;;  %v394_v48 = vsel %vm392_vm0, %v630_v43, 0 }
  0x6a   : > { %v393_v49 = vsel %vm392_vm0, %v372_v46, 0 }
  0x6b   : > { %v416_v50 = vshrl.u32 %v414_v47, 16  ;;  %v395_v51 = vadd.s32 %v394_v48, %v393_v49  ;;  %v415_v58 = vand.u32 65535, %v414_v47 }
  0x6d   : > { %v418_v52 = vcvt.s32.f32 %v416_v50  ;;  %v396_v53 = vand.u32 65535, %v395_v51  ;;  %v397_v54 = vshrl.u32 %v395_v51, 16  ;;  %v417_v60 = vcvt.s32.f32 %v415_v58 }
  0x6f   : > { %421 = vadd.xlane.f32.xlu0 %v418_v52  ;;  %v398_v56 = vcvt.s32.f32 %v396_v53  ;;  %v399_v57 = vcvt.s32.f32 %v397_v54 }
  0x71   : > { %400 = vadd.xlane.f32.xlu1 %v398_v56 }
  0x73   : > { %402 = vadd.xlane.f32.xlu0 %v399_v57 }
  0x75   : > { %437 = vadd.xlane.f32.xlu1 %v435_v59 }
  0x77   : > { %419 = vadd.xlane.f32.xlu0 %v417_v60 }
  0xf1   : > { %v440_v61 = vpop.xlane.xlu1 %439 }
  0xf2   : > { %v442_v0 = vcvt.f32.s32 %v440_v61 }
  0xf4   : > { %v443_v5 = vshll.u32 %v442_v0, 16 }
  0xfc   : > { %v422_v62 = vpop.xlane.xlu0 %421 }
  0xfd   : > { %v424_v2 = vcvt.f32.s32 %v422_v62 }
  0xfe   : > { %v401_v63 = vpop.xlane.xlu1 %400 }
  0xff   : > { %v404_v6 = vcvt.f32.s32 %v401_v63  ;;  %v425_v10 = vshll.u32 %v424_v2, 16 }
 0x100   : > { %v403_v1 = vpop.xlane.xlu0 %402 }
 0x101   : > { %v405_v3 = vcvt.f32.s32 %v403_v1 }
 0x102   : > { %v438_v4 = vpop.xlane.xlu1 %437 }
 0x103   : > { %v406_v7 = vshll.u32 %v405_v3, 16  ;;  %v441_v8 = vcvt.f32.s32 %v438_v4 }
 0x104   : > { %v420_v9 = vpop.xlane.xlu0 %419 }
 0x105   : > { %v407_v11 = vadd.s32 %v406_v7, %v404_v6  ;;  %v444_v12 = vadd.s32 %v443_v5, %v441_v8  ;;  %v423_v13 = vcvt.f32.s32 %v420_v9 }
 0x107   : > { %409 = vst.msk [vmem:[%s286_s21] sm:$0xf] %vm408_vm15, %v407_v11  ;;  %445 = vst.msk [vmem:[%s294_s25] sm:$0xf] %vm408_vm15, %v444_v12  ;;  %v426_v14 = vadd.s32 %v425_v10, %v423_v13 }
 0x109   : > { %427 = vst.msk [vmem:[%s290_s28] sm:$0xf] %vm408_vm15, %v426_v14 }
 0x10a PF: > { %s21_s20 = sadd.s32 1, %s808_s20   ;;  %s1035_s15 = smov %s792_s16 }
 0x10b   : > { %p18_p9 = scmp.ge.s32.totalorder %s21_s20, 6   ;;  %s1036_s16 = smov %s796_s17 }
 0x10c   : > { %s1037_s17 = smov %s887_s27  ;;  %s1038_s18 = smov %s804_s19 }
 0x10d   : > { %s1039_s19 = smov %s1041_s22  ;;  %20 = sbr.rel (!%p18_p9) target bundleno = 6 (0x6), region = 113 }
 0x114   :  { %493 = vsyncpa [#allocation6], 1 }
 0x115   :  { %495 = vsyncpa [#allocation6 + $0x1], 1 }
 0x116   :  { %496 = vsyncpa [#allocation8], 1 }
 0x117   :  { %498 = vsyncpa [#allocation8 + $0x1], 1 }

</bundles_post_ra>
